<compile_context>
chip_gen: v7x
topology: tpu7x:2x2x1
jax: 0.10.0
libtpu: 0.0.40
codegen_flags: <defaults>
</compile_context>

<pallas_src>
import math

import jax
import jax.numpy as jnp
from jax.experimental import pallas as pl
from jax.experimental.pallas import tpu as pltpu


def criticv_kernel(state_ref, w1_ref, b1_ref, w2_ref, b2_ref, w3_ref, b3_ref,
                   value_ref):
    """Fused 3-layer MLP value head: Linear+ReLU -> Linear+ReLU -> Linear."""
    x = state_ref[...]

    # hidden1 + ReLU  (MXU matmul, f32 accumulate)
    h1 = jnp.dot(x, w1_ref[...], preferred_element_type=jnp.float32) + b1_ref[...]
    h1 = jnp.maximum(h1, 0.0)

    # hidden2 + ReLU
    h2 = jnp.dot(h1, w2_ref[...], preferred_element_type=jnp.float32) + b2_ref[...]
    h2 = jnp.maximum(h2, 0.0)

    # value head (out_dim = 1)
    v = jnp.dot(h2, w3_ref[...], preferred_element_type=jnp.float32) + b3_ref[...]
    value_ref[...] = v.astype(value_ref.dtype)


def criticv_forward(state, params, *, tile_b=None):
    """Calls the fused Pallas kernel. state: (B, in_dim) -> value: (B, 1)."""
    B, in_dim = state.shape
    h1 = params["w1"].shape[1]
    h2 = params["w2"].shape[1]

    if tile_b is None:
        # Largest reasonable row tile; weights stay resident so VMEM cost is
        # dominated by the (tile_b, max(in_dim, h1, h2)) activation tiles.
        tile_b = min(B, 512)
    tile_b = min(tile_b, B)
    assert B % tile_b == 0, "batch must be divisible by the batch tile"

    grid = (B // tile_b,)

    flops = 2 * B * (in_dim * h1 + h1 * h2 + h2 * 1)
    bytes_accessed = 4 * (B * in_dim                      # state in
                          + in_dim * h1 + h1              # layer 1
                          + h1 * h2 + h2                  # layer 2
                          + h2 * 1 + 1                    # head
                          + B * 1)                        # value out
    cost = pl.CostEstimate(flops=flops, transcendentals=0,
                           bytes_accessed=bytes_accessed)

    return pl.pallas_call(
        criticv_kernel,
        out_shape=jax.ShapeDtypeStruct((B, 1), jnp.float32),
        grid=grid,
        in_specs=[
            # batch-blocked activation input
            pl.BlockSpec((tile_b, in_dim), lambda i: (i, 0)),
            # resident weights / biases (same block for every grid step)
            pl.BlockSpec((in_dim, h1), lambda i: (0, 0)),
            pl.BlockSpec((1, h1), lambda i: (0, 0)),
            pl.BlockSpec((h1, h2), lambda i: (0, 0)),
            pl.BlockSpec((1, h2), lambda i: (0, 0)),
            pl.BlockSpec((h2, 1), lambda i: (0, 0)),
            pl.BlockSpec((1, 1), lambda i: (0, 0)),
        ],
        out_specs=pl.BlockSpec((tile_b, 1), lambda i: (i, 0)),
        compiler_params=pltpu.CompilerParams(
            dimension_semantics=("parallel",),   # shard batch across TCs (v7x)
            vmem_limit_bytes=32 * 1024 * 1024,
        ),
        cost_estimate=cost,
    )(
        state,
        params["w1"], params["b1"],
        params["w2"], params["b2"],
        params["w3"], params["b3"],
    )


def init_params(key, in_dim, hidden_dim1=256, hidden_dim2=256):
    """Init matching the PyTorch module (weights pre-transposed to (fan_in, fan_out))."""
    ks = jax.random.split(key, 6)

    def u(k, shape, bound):
        return jax.random.uniform(k, shape, jnp.float32, -bound, bound)

    b1 = 1.0 / math.sqrt(in_dim)          # PyTorch default nn.Linear init
    b2 = 1.0 / math.sqrt(hidden_dim1)
    head = 0.003                          # init_layer_uniform on self.out

    return {
        "w1": u(ks[0], (in_dim, hidden_dim1), b1),
        "b1": u(ks[1], (1, hidden_dim1), b1),
        "w2": u(ks[2], (hidden_dim1, hidden_dim2), b2),
        "b2": u(ks[3], (1, hidden_dim2), b2),
        "w3": u(ks[4], (hidden_dim2, 1), head),
        "b3": u(ks[5], (1, 1), head),
    }


def criticv_reference(state, params):
    """Pure-JAX reference for correctness checking."""
    h1 = jnp.maximum(state @ params["w1"] + params["b1"], 0.0)
    h2 = jnp.maximum(h1 @ params["w2"] + params["b2"], 0.0)
    return h2 @ params["w3"] + params["b3"]


if __name__ == "__main__":
    # Small shapes consistent with the module's forward (state: (B, in_dim)).
    B, IN_DIM, H1, H2 = 16, 16, 32, 32

    key = jax.random.PRNGKey(0)
    k_param, k_state = jax.random.split(key, 2)

    params = init_params(k_param, IN_DIM, H1, H2)
    state = jax.random.normal(k_state, (B, IN_DIM), jnp.float32)

    # tile_b=8 -> grid of 2 batch tiles, exercising the pipelined grid path.
    value = criticv_forward(state, params, tile_b=8)
    jax.block_until_ready(value)

    assert value.shape == (B, 1)
    ref = criticv_reference(state, params)
    assert bool(jnp.all(jnp.isfinite(value)))
    assert bool(jnp.allclose(value, ref, atol=1e-5, rtol=1e-5))
    print("KERNEL_OK")
</pallas_src>

<mosaic_0001>
module attributes {stable_mosaic.version = 11 : i64} {
  func.func @criticv_kernel(%arg0: i32, %arg1: memref<8x16xf32, #tpu.memory_space<vmem>>, %arg2: memref<16x32xf32, #tpu.memory_space<vmem>>, %arg3: memref<1x32xf32, #tpu.memory_space<vmem>>, %arg4: memref<32x32xf32, #tpu.memory_space<vmem>>, %arg5: memref<1x32xf32, #tpu.memory_space<vmem>>, %arg6: memref<32x1xf32, #tpu.memory_space<vmem>>, %arg7: memref<1x1xf32, #tpu.memory_space<vmem>>, %arg8: memref<8x1xf32, #tpu.memory_space<vmem>>) attributes {dimension_semantics = [#tpu.dimension_semantics<parallel>], iteration_bounds = array<i64: 2>, scalar_prefetch = 0 : i64, scratch_operands = 0 : i64, tpu.core_type = #tpu.core_type<tc>, window_params = [{transform_indices = @transform_0, window_bounds = array<i64: 8, 16>}, {pipeline_mode = #tpu.pipeline_mode<synchronous>, transform_indices = @transform_1, window_bounds = array<i64: 16, 32>}, {pipeline_mode = #tpu.pipeline_mode<synchronous>, transform_indices = @transform_2, window_bounds = array<i64: 1, 32>}, {pipeline_mode = #tpu.pipeline_mode<synchronous>, transform_indices = @transform_3, window_bounds = array<i64: 32, 32>}, {pipeline_mode = #tpu.pipeline_mode<synchronous>, transform_indices = @transform_4, window_bounds = array<i64: 1, 32>}, {pipeline_mode = #tpu.pipeline_mode<synchronous>, transform_indices = @transform_5, window_bounds = array<i64: 32, 1>}, {pipeline_mode = #tpu.pipeline_mode<synchronous>, transform_indices = @transform_6, window_bounds = array<i64: 1, 1>}, {transform_indices = @transform_7, window_bounds = array<i64: 8, 1>}]} {
    %c0 = arith.constant 0 : index
    %c0_0 = arith.constant 0 : index
    %0 = vector.load %arg1[%c0, %c0_0] : memref<8x16xf32, #tpu.memory_space<vmem>>, vector<8x16xf32>
    %c0_1 = arith.constant 0 : index
    %c0_2 = arith.constant 0 : index
    %1 = vector.load %arg2[%c0_1, %c0_2] : memref<16x32xf32, #tpu.memory_space<vmem>>, vector<16x32xf32>
    %cst = arith.constant dense<0.000000e+00> : vector<8x32xf32>
    %2 = tpu.matmul %0, %1, %cst {dimension_numbers = #tpu.dot_dimension_numbers<[1], [0], [0], [1], [0, 0, 1, 1], [], []>} : vector<8x16xf32>, vector<16x32xf32>, vector<8x32xf32> -> vector<8x32xf32>
    %c0_3 = arith.constant 0 : index
    %c0_4 = arith.constant 0 : index
    %3 = vector.load %arg3[%c0_3, %c0_4] : memref<1x32xf32, #tpu.memory_space<vmem>>, vector<1x32xf32>
    %4 = vector.broadcast %3 : vector<1x32xf32> to vector<8x32xf32>
    %5 = arith.addf %2, %4 : vector<8x32xf32>
    %cst_5 = arith.constant 0.000000e+00 : f32
    %6 = vector.broadcast %cst_5 : f32 to vector<8x32xf32>
    %7 = arith.maximumf %5, %6 : vector<8x32xf32>
    %c0_6 = arith.constant 0 : index
    %c0_7 = arith.constant 0 : index
    %8 = vector.load %arg4[%c0_6, %c0_7] : memref<32x32xf32, #tpu.memory_space<vmem>>, vector<32x32xf32>
    %cst_8 = arith.constant dense<0.000000e+00> : vector<8x32xf32>
    %9 = tpu.matmul %7, %8, %cst_8 {dimension_numbers = #tpu.dot_dimension_numbers<[1], [0], [0], [1], [0, 0, 1, 1], [], []>} : vector<8x32xf32>, vector<32x32xf32>, vector<8x32xf32> -> vector<8x32xf32>
    %c0_9 = arith.constant 0 : index
    %c0_10 = arith.constant 0 : index
    %10 = vector.load %arg5[%c0_9, %c0_10] : memref<1x32xf32, #tpu.memory_space<vmem>>, vector<1x32xf32>
    %11 = vector.broadcast %10 : vector<1x32xf32> to vector<8x32xf32>
    %12 = arith.addf %9, %11 : vector<8x32xf32>
    %cst_11 = arith.constant 0.000000e+00 : f32
    %13 = vector.broadcast %cst_11 : f32 to vector<8x32xf32>
    %14 = arith.maximumf %12, %13 : vector<8x32xf32>
    %c0_12 = arith.constant 0 : index
    %c0_13 = arith.constant 0 : index
    %15 = vector.load %arg6[%c0_12, %c0_13] : memref<32x1xf32, #tpu.memory_space<vmem>>, vector<32x1xf32>
    %cst_14 = arith.constant dense<0.000000e+00> : vector<8x1xf32>
    %16 = tpu.matmul %14, %15, %cst_14 {dimension_numbers = #tpu.dot_dimension_numbers<[1], [0], [0], [1], [0, 0, 1, 1], [], []>} : vector<8x32xf32>, vector<32x1xf32>, vector<8x1xf32> -> vector<8x1xf32>
    %c0_15 = arith.constant 0 : index
    %c0_16 = arith.constant 0 : index
    %17 = vector.load %arg7[%c0_15, %c0_16] : memref<1x1xf32, #tpu.memory_space<vmem>>, vector<1x1xf32>
    %18 = vector.broadcast %17 : vector<1x1xf32> to vector<8x1xf32>
    %19 = arith.addf %16, %18 : vector<8x1xf32>
    %c0_17 = arith.constant 0 : index
    %c0_18 = arith.constant 0 : index
    %20 = vector.load %arg8[%c0_17, %c0_18] : memref<8x1xf32, #tpu.memory_space<vmem>>, vector<8x1xf32>
    tpu.vector_store %arg8[%c0_17, %c0_18], %19 {strides = array<i32>} : memref<8x1xf32, #tpu.memory_space<vmem>>, vector<8x1xf32>,
    return
  }
  func.func @transform_0(%arg0: i32) -> (i32, i32) {
    %c0_i32 = arith.constant 0 : i32
    %c0_i32_0 = arith.constant 0 : i32
    return %arg0, %c0_i32 : i32, i32
  }
  func.func @transform_1(%arg0: i32) -> (i32, i32) {
    %c0_i32 = arith.constant 0 : i32
    %c0_i32_0 = arith.constant 0 : i32
    %c0_i32_1 = arith.constant 0 : i32
    return %c0_i32, %c0_i32_0 : i32, i32
  }
  func.func @transform_2(%arg0: i32) -> (i32, i32) {
    %c0_i32 = arith.constant 0 : i32
    %c0_i32_0 = arith.constant 0 : i32
    %c0_i32_1 = arith.constant 0 : i32
    return %c0_i32, %c0_i32_0 : i32, i32
  }
  func.func @transform_3(%arg0: i32) -> (i32, i32) {
    %c0_i32 = arith.constant 0 : i32
    %c0_i32_0 = arith.constant 0 : i32
    %c0_i32_1 = arith.constant 0 : i32
    return %c0_i32, %c0_i32_0 : i32, i32
  }
  func.func @transform_4(%arg0: i32) -> (i32, i32) {
    %c0_i32 = arith.constant 0 : i32
    %c0_i32_0 = arith.constant 0 : i32
    %c0_i32_1 = arith.constant 0 : i32
    return %c0_i32, %c0_i32_0 : i32, i32
  }
  func.func @transform_5(%arg0: i32) -> (i32, i32) {
    %c0_i32 = arith.constant 0 : i32
    %c0_i32_0 = arith.constant 0 : i32
    %c0_i32_1 = arith.constant 0 : i32
    return %c0_i32, %c0_i32_0 : i32, i32
  }
  func.func @transform_6(%arg0: i32) -> (i32, i32) {
    %c0_i32 = arith.constant 0 : i32
    %c0_i32_0 = arith.constant 0 : i32
    %c0_i32_1 = arith.constant 0 : i32
    return %c0_i32, %c0_i32_0 : i32, i32
  }
  func.func @transform_7(%arg0: i32) -> (i32, i32) {
    %c0_i32 = arith.constant 0 : i32
    %c0_i32_0 = arith.constant 0 : i32
    return %arg0, %c0_i32 : i32, i32
  }
}

</mosaic_0001>

<bundles_post_ra>
// kernel: tpu_custom_call.1
= control target key start
LH: loop header
LB: loop body
LE: loop exit
PB: predicated region body
PF: predicated region fallthrough
CT: control target
= control target key end

     0   :  { %s999_s0 = inlined_call_operand.vmem [shape: f32[16,16], index: 0, kind: input, shape index: {}]   ;;  %s1000_s1 = inlined_call_operand.hbm [shape: f32[16,32], index: 1, kind: input, shape index: {}]   ;;  %s1001_s2 = inlined_call_operand.hbm [shape: f32[1,32], index: 2, kind: input, shape index: {}]   ;;  %s1002_s3 = inlined_call_operand.vmem [shape: f32[32,32], index: 3, kind: input, shape index: {}]   ;;  %s1003_s4 = inlined_call_operand.vmem [shape: f32[1,32], index: 4, kind: input, shape index: {}]   ;;  %s1004_s5 = inlined_call_operand.vmem [shape: f32[32,1], index: 5, kind: input, shape index: {}]   ;;  %s1005_s6 = inlined_call_operand.<no memory space> [shape: f32[1,1], index: 6, kind: input, shape index: {}]   ;;  %s1006_s7 = inlined_call_operand.vmem [shape: f32[16,1], index: 7, kind: output, shape index: {}]  }
   0x1   :  { %v12_v0 = vstv %s1005_s6 }
   0x2   :  { %13 = vst [vmem:[#allocation2] sm:$0x1] %v12_v0 }
   0x3   :  { %14 = vsyncpa [#allocation4], 0 }
   0x4   :  { %15 = vsyncpa [#allocation6], 0  ;;  %s868_s26 = smov 0  }
   0x5 LB: > { %s874_s27 = sadd.s32 4294967295, %s816_s26   ;;  %p638_p0 = scmp.ge.s32.totalorder %s816_s26, 1  ;;  %s816_s26 = sphi %s868_s26, %s21_s26  }
   0x6   : > { %p204_p1 = scmp.lt.s32.totalorder %s816_s26, 3  ;;  %s818_s6 = smov [#allocation3]  }
   0x7   : > { %s216_s28 = sshll.u32 %s818_s6, 4  ;;  %p1007_p3 = scmp.eq.s32.totalorder %s874_s27, 0  ;;  %s217_s28 = int_to_ptr.vmem [resolvable:$true] %s216_s28 }
   0x8   : > { %p878_p2 = pnand %p638_p0, %p204_p1  ;;  %s819_s30 = smov [#allocation5]  }
   0x9   : > { %s230_s8 = sshll.u32 %s819_s30, 4  ;;  %s746_s12 = scalar_lea.hbm %s1000_s1, 256  ;;  %s891_s8 = int_to_ptr.vmem [resolvable:$true] %s230_s8 }
   0xa   : > { %s1009_s29 = scalar_select %p878_p2, 1, 0 }
   0xb   : > { %p720_p4 = pneg %p878_p2  ;;  %p747_p6 = scmp.ne.s32.totalorder %s1000_s1, %s746_s12 }
   0xc   : > { %p753_p10 = scmp.lt.u32.totalorder %s746_s12, %s1000_s1 }
   0xd   : > { %p887_p5 = pnand %p1007_p3, %p720_p4 }
   0xf   : > { %p748_p7 = pneg %p887_p5 }
  0x11   : > { %p749_p8 = pnand %p748_p7, %p747_p6 }
  0x13   : > { %p750_p9 = pneg %p749_p8 }
  0x15   : > { %p755_p11 = pnand %p753_p10, %p750_p9 }
  0x17   : > { %758 = shalt.err (!%p755_p11)
}
  0x18   : > { %s759_s17 = scalar_lea.vmem %s217_s28, 256  ;;  %p767_p1 = scmp.lt.s32.totalorder %s217_s28, %s217_s28 }
  0x19   : > { %p760_p12 = scmp.ne.s32.totalorder %s217_s28, %s759_s17  ;;  %p768_p4 = scmp.lt.s32.totalorder %s759_s17, %s759_s17 }
  0x1b   : > { %p762_p13 = pnand %p760_p12, %p748_p7  ;;  %p769_p3 = por %p768_p4, %p767_p1 }
  0x1d   : > { %p763_p0 = pneg %p762_p13 }
  0x1f   : > { %p770_p2 = pnand %p769_p3, %p763_p0 }
  0x21   : > { %773 = shalt.err (!%p770_p2)
}
  0x22   : > { %s820_s18 = smov 128   ;;  %s821_s19 = smov 8  }
  0x23   : > { %723 = dma.hbm_to_vmem [thread:$0]  (!%p887_p5), %s1000_s1, 256, %s217_s28, [#allocation4], %s820_s18, %s820_s18, %s821_s19  }
  0x24   : > { %s774_s24 = scalar_lea.hbm %s1001_s2, 16 }
  0x25   : > { %p775_p6 = scmp.ne.s32.totalorder %s1001_s2, %s774_s24  ;;  %p781_p8 = scmp.lt.u32.totalorder %s774_s24, %s1001_s2 }
  0x27   : > { %p777_p2 = pnand %p775_p6, %p748_p7 }
  0x29   : > { %p778_p3 = pneg %p777_p2 }
  0x2b   : > { %p783_p9 = pnand %p781_p8, %p778_p3 }
  0x2d   : > { %786 = shalt.err (!%p783_p9)
}
  0x2e   : > { %s787_s28 = scalar_lea.vmem %s891_s8, 16  ;;  %s794_s11 = scalar_lea.vmem %s891_s8, 32 }
  0x2f   : > { %p788_p10 = scmp.ne.s32.totalorder %s891_s8, %s787_s28  ;;  %p795_p13 = scmp.lt.s32.totalorder %s891_s8, %s891_s8 }
  0x30   : > { %p796_p0 = scmp.lt.s32.totalorder %s794_s11, %s787_s28 }
  0x31   : > { %p790_p11 = pnand %p788_p10, %p748_p7 }
  0x32   : > { %p797_p1 = por %p796_p0, %p795_p13 }
  0x33   : > { %p791_p12 = pneg %p790_p11 }
  0x35   : > { %p798_p4 = pnand %p797_p1, %p791_p12 }
  0x37   : > { %801 = shalt.err (!%p798_p4)
}
  0x38   : > { %726 = dma.hbm_to_vmem [thread:$0]  (!%p887_p5), %s1001_s2, 16, %s891_s8, [#allocation6]  }
  0x39   : > { %p1011_p6 = scmp.ne.s32.totalorder %s1009_s29, 0 }
  0x3a   : > { %p1012_p7 = scmp.eq.s32.totalorder (!%p1011_p6), %s874_s27, 0 }
  0x3b   : > { %262 = sbr.rel (%p1011_p6) target bundleno = 725 (0x2d5), region = 48 }
  0x42   : > { %807 = dma.done.wait (%p1012_p7), [#allocation4], 256   ;;  %p1013_p2 = pmov %p1012_p7 }
  0x44   : > { %809 = vsyncadd (%p1013_p2), [#allocation4], 4294967040  ;;  %p1014_p3 = pmov %p1013_p2 }
  0x45   : > { %p1015_p8 = pmov %p1013_p2 }
  0x46   : > { %811 = dma.done.wait (%p1014_p3), [#allocation6], 16  }
  0x47   : > { %813 = vsyncadd (%p1015_p8), [#allocation6], 4294967280  ;;  %p296_p9 = scmp.lt.s32.totalorder %s874_s27, 1  ;;  %v822_v1 = vmov 0.0|0.0   ;;  %vm823_vm0 = vmmov 0   ;;  %v824_v2 = vmov 0.0  }
  0x48   : > { %697 = vmatprep.subr.bf16.mxu0 %v822_v1  ;;  %672 = vmatprep.mubr.msk.f32.mxu0 %vm823_vm0, %v824_v2  ;;  %v305_v3 = vld [vmem:[#allocation3] sm:$0xff]  ;;  %v306_v4 = vld [vmem:[#allocation3 + $0x8] sm:$0xff]  ;;  %vm314_vm1 = vcmask 130048   ;;  %v392_v11 = vld [vmem:[%s1002_s3 + $0x18] sm:$0xff]  ;;  %vm400_vm2 = vcmask 261120   ;;  %vm559_vm3 = vcmask 7168  }
  0x49   : > { %s1017_s27 = smov (!%p296_p9, %s874_s27), 1  ;;  %700 = vmatprep.subr.bf16.mxu1 %v822_v1  ;;  %683 = vmatprep.mubr.msk.f32.mxu1 %vm823_vm0, %v824_v2  ;;  %v698_v5 = vpack.c.bf16 %v306_v4, %v305_v3  ;;  %v389_v6 = vld [vmem:[%s1002_s3] sm:$0xff]  ;;  %v390_v7 = vld [vmem:[%s1002_s3 + $0x8] sm:$0xff]  ;;  %v391_v10 = vld [vmem:[%s1002_s3 + $0x10] sm:$0xff] }
  0x4a   : > { %s645_s29 = sshll.u32 %s1017_s27, 3  ;;  %v701_v8 = vpack.c.bf16 %v390_v7, %v389_v6  ;;  %v704_v12 = vpack.c.bf16 %v392_v11, %v391_v10  ;;  %v475_v13 = vld [vmem:[%s1004_s5] sm:$0xff]  ;;  %v476_v14 = vld [vmem:[%s1004_s5 + $0x8] sm:$0xff]  ;;  %v647_v16 = vld [vmem:[#allocation5] ss:$0 sm:$0xff] }
  0x4b   : > { %s299_s14 = scalar_lea.vmem %s999_s0, %s645_s29  ;;  %699 = vmatpush3.bf16.msra.mxu0 %v698_v5  ;;  %v707_v15 = vpack.c.bf16 %v476_v14, %v475_v13  ;;  %v477_v21 = vld [vmem:[%s1004_s5 + $0x10] sm:$0xff]  ;;  %v478_v22 = vld [vmem:[%s1004_s5 + $0x18] sm:$0xff]  ;;  %v649_v24 = vld [vmem:[%s1003_s4] ss:$0 sm:$0xff] }
  0x4c   : > { %v304_v9 = vld [vmem:[%s299_s14] sm:$0xff]  ;;  %702 = vmatpush3.bf16.msra.mxu1 %v701_v8  ;;  %706 = vmatprep.subr.bf16.mxu0 %v822_v1  ;;  %v710_v23 = vpack.c.bf16 %v478_v22, %v477_v21  ;;  %s303_s14 = scalar_lea.vmem %s1006_s7, %s645_s29 }
  0x4d   : > { %703 = vmatprep.subr.bf16.mxu1 %v822_v1  ;;  %v651_v29 = vld [vmem:[#allocation2] ss:$0 sm:$0xff] }
  0x4e   : > { %673 = vmatmul.mubr.msk.f32.vlgmr.msra.gmra.mrb[0].mxu0 %vm314_vm1, %v304_v9 }
  0x4f   : > { %694 = vmatprep.mubr.msk.f32.mxu0 %vm823_vm0, %v824_v2  ;;  %708 = vmatpush3.bf16.msra.mxu0 %v707_v15 }
  0x50   : > { %705 = vmatpush3.bf16.msra.mxu1 %v704_v12  ;;  %709 = vmatprep.subr.bf16.mxu0 %v822_v1 }
  0x53   : > { %711 = vmatpush3.bf16.msra.mxu0 %v710_v23 }
 0x121   : > { %v384_v17 = vpop.f32.mrb[0].mxu0 }
 0x122   : > { %v385_v18 = vadd.f32 %v647_v16, %v384_v17  ;;  %v674_v19 = vpop.f32.mrb[1].mxu0 }
 0x124   : > { %v388_v20 = vmax.f32 %v385_v18, 0.0 }
 0x126   : > { %684 = vmatmul.mubr.msk.f32.vlgmr.msra.gmra.mrb[0].mxu1 %vm400_vm2, %v388_v20 }
 0x1f9   : > { %v470_v25 = vpop.f32.mrb[0].mxu1 }
 0x1fa   : > { %v471_v26 = vadd.f32 %v649_v24, %v470_v25  ;;  %v685_v27 = vpop.f32.mrb[1].mxu1 }
 0x1fc   : > { %v474_v28 = vmax.f32 %v471_v26, 0.0 }
 0x1fe   : > { %695 = vmatmul.mubr.msk.f32.vlgmr.msra.gmra.mrb[2].mxu0 %vm400_vm2, %v474_v28 }
 0x2d1   : > { %v555_v30 = vpop.f32.mrb[2].mxu0 }
 0x2d2   : > { %v556_v31 = vadd.f32 %v651_v29, %v555_v30  ;;  %v696_v32 = vpop.f32.mrb[3].mxu0 }
 0x2d4   : > { %560 = vst.msk [vmem:[%s303_s14] sm:$0xff] %vm559_vm3, %v556_v31 }
 0x2d5 PF: > { %s21_s26 = sadd.s32 1, %s816_s26  }
 0x2d6   : > { %p18_p5 = scmp.ge.s32.totalorder %s21_s26, 4  }
 0x2d8   :  { %20 = sbr.rel (!%p18_p5) target bundleno = 5 (0x5), region = 87 }
 0x2df   :  { %580 = vsyncpa [#allocation4], 1 }
 0x2e0   :  { %582 = vsyncpa [#allocation4 + $0x1], 1 }
 0x2e1   :  { %583 = vsyncpa [#allocation6], 1 }

</bundles_post_ra>
